<compile_context>
chip_gen: v7x
topology: tpu7x:2x2x1
jax: 0.10.0
libtpu: 0.0.40
codegen_flags: <defaults>
</compile_context>

<pallas_src>
import functools

import jax
import jax.numpy as jnp
from jax.experimental import pallas as pl
from jax.experimental.pallas import tpu as pltpu

BETA = 0.7
GAMMA = 0.75
_VMEM_BLOCK_BUDGET = 8 * 1024 * 1024   # bytes of double-buffered input blocks
_VMEM_LIMIT = 32 * 1024 * 1024         # scoped VMEM limit (safe on v5e/v6e/v7x)


def _round_up(x, m):
    return ((x + m - 1) // m) * m


def _cdiv(a, b):
    return (a + b - 1) // b


def _focal_tversky_kernel(yp_ref, yt_ref, out_ref, tp_acc, st_acc, *, hw):
    # yp_ref / yt_ref: (1, C, TILE_HW) blocks; out_ref: (1, 8, 128) per-sample slab.
    k = pl.program_id(1)
    nk = pl.num_programs(1)

    @pl.when(k == 0)
    def _init():
        tp_acc[...] = jnp.zeros_like(tp_acc)
        st_acc[...] = jnp.zeros_like(st_acc)

    logits = yp_ref[0].astype(jnp.float32)   # (C, TILE_HW)
    y_true = yt_ref[0].astype(jnp.float32)   # (C, TILE_HW)

    # Channel softmax without materializing probabilities:
    #   tp_col = sum_c(softmax(logits) * y_true) = sum_c(e * y_true) / sum_c(e)
    m = jnp.max(logits, axis=0, keepdims=True)            # (1, TILE_HW)
    e = jnp.exp(logits - m)                                # (C, TILE_HW)
    den = jnp.sum(e, axis=0, keepdims=True)                # (1, TILE_HW)
    num = jnp.sum(e * y_true, axis=0, keepdims=True)       # (1, TILE_HW)
    tp_col = num / den                                     # one divide per column

    # Zero-padded columns contribute 0 (y_true == 0 there; den == C > 0), so no
    # masking is required.  Cross-lane reduce per tile rides the idle XLU slot.
    st_col = jnp.sum(y_true, axis=0, keepdims=True)        # (1, TILE_HW)
    tp_acc[...] += jnp.sum(tp_col, axis=1, keepdims=True)  # (1, 1)
    st_acc[...] += jnp.sum(st_col, axis=1, keepdims=True)  # (1, 1)

    @pl.when(k == nk - 1)
    def _finalize():
        tp = tp_acc[...]                     # (1, 1)
        s_t = st_acc[...]                    # (1, 1)
        fn = s_t - tp
        # sum_c(softmax) == 1 for every column, so sum(y_pred) over the real
        # (unpadded) spatial extent is exactly HW.
        fp = jnp.float32(hw) - tp
        ti = tp / (tp + BETA * fn + (1.0 - BETA) * fp)
        focal = jnp.maximum(1.0 - ti, 0.0) ** GAMMA        # clamp avoids NaN from pow
        out_ref[...] = jnp.broadcast_to(focal, out_ref.shape).astype(out_ref.dtype)


def focal_tversky_loss(y_pred_nchw, y_true_nchw):
    """y_pred_nchw: logits (B, C, H, W); y_true_nchw: targets (B, C, H, W)."""
    B, C, H, W = y_pred_nchw.shape
    HW = H * W
    # Ship native dtypes (no extra HBM pass); cast to f32 inside the kernel.
    yp = y_pred_nchw.reshape(B, C, HW)
    yt = y_true_nchw.reshape(B, C, HW)

    itemsize_sum = yp.dtype.itemsize + yt.dtype.itemsize
    bytes_per_col = 2 * C * itemsize_sum                   # 2 pipeline buffers
    max_tile = max(128, (_VMEM_BLOCK_BUDGET // bytes_per_col) // 128 * 128)

    hw_lanes = _round_up(HW, 128)
    nk = _cdiv(hw_lanes, max_tile)
    tile_hw = _round_up(_cdiv(hw_lanes, nk), 128)          # balanced tiles
    hw_padded = nk * tile_hw
    if hw_padded != HW:
        pad = hw_padded - HW
        yp = jnp.pad(yp, ((0, 0), (0, 0), (0, pad)))
        yt = jnp.pad(yt, ((0, 0), (0, 0), (0, pad)))

    kernel = functools.partial(_focal_tversky_kernel, hw=HW)

    cost = pl.CostEstimate(
        flops=int(6 * B * C * HW),
        transcendentals=int(B * C * HW),
        bytes_accessed=int(B * C * HW * itemsize_sum),
    )

    out = pl.pallas_call(
        kernel,
        out_shape=jax.ShapeDtypeStruct((B, 8, 128), jnp.float32),
        grid_spec=pltpu.PrefetchScalarGridSpec(
            num_scalar_prefetch=0,
            grid=(B, nk),
            in_specs=[
                pl.BlockSpec((1, C, tile_hw), lambda b, k: (b, 0, k)),
                pl.BlockSpec((1, C, tile_hw), lambda b, k: (b, 0, k)),
            ],
            out_specs=pl.BlockSpec((1, 8, 128), lambda b, k: (b, 0, 0)),
            scratch_shapes=[
                pltpu.VMEM((1, 1), jnp.float32),   # tp accumulator
                pltpu.VMEM((1, 1), jnp.float32),   # sum(y_true) accumulator
            ],
        ),
        compiler_params=pltpu.CompilerParams(
            dimension_semantics=("parallel", "arbitrary"),
            vmem_limit_bytes=_VMEM_LIMIT,
        ),
        cost_estimate=cost,
    )(yp, yt)

    per_sample = out[:, 0, 0]          # (B,) focal-tversky terms
    return jnp.mean(per_sample)


def _reference(y_pred_nchw, y_true_nchw):
    # Pure-JAX reference mirroring the PyTorch module (direct tp/fn/fp formulas).
    B = y_pred_nchw.shape[0]
    yp = jax.nn.softmax(y_pred_nchw.astype(jnp.float32), axis=1).reshape(B, -1)
    yt = y_true_nchw.astype(jnp.float32).reshape(B, -1)
    tp = jnp.sum(yp * yt, axis=1)
    fn = jnp.sum((1.0 - yp) * yt, axis=1)
    fp = jnp.sum(yp * (1.0 - yt), axis=1)
    ti = tp / (tp + BETA * fn + (1.0 - BETA) * fp)
    return jnp.mean((1.0 - ti) ** GAMMA)


if __name__ == "__main__":
    key = jax.random.PRNGKey(0)
    k1, k2 = jax.random.split(key)

    B, C, H, W = 2, 4, 16, 16
    y_pred = jax.random.normal(k1, (B, C, H, W), dtype=jnp.float32)            # logits
    y_true = (jax.random.uniform(k2, (B, C, H, W)) > 0.5).astype(jnp.float32)  # mask

    loss = jax.block_until_ready(focal_tversky_loss(y_pred, y_true))
    ref = jax.block_until_ready(_reference(y_pred, y_true))
    assert jnp.allclose(loss, ref, rtol=1e-5, atol=1e-5), (loss, ref)
    print("KERNEL_OK")
</pallas_src>

<mosaic_0001>
module attributes {stable_mosaic.version = 11 : i64} {
  func.func @_focal_tversky_kernel(%arg0: i32, %arg1: i32, %arg2: memref<1x4x256xf32, #tpu.memory_space<vmem>>, %arg3: memref<1x4x256xf32, #tpu.memory_space<vmem>>, %arg4: memref<1x8x128xf32, #tpu.memory_space<vmem>>, %arg5: memref<1x1xf32, #tpu.memory_space<vmem>>, %arg6: memref<1x1xf32, #tpu.memory_space<vmem>>) attributes {dimension_semantics = [#tpu.dimension_semantics<parallel>, #tpu.dimension_semantics<arbitrary>], iteration_bounds = array<i64: 2, 1>, scalar_prefetch = 0 : i64, scratch_operands = 2 : i64, tpu.core_type = #tpu.core_type<tc>, window_params = [{transform_indices = @transform_0, window_bounds = array<i64: 1, 4, 256>}, {transform_indices = @transform_1, window_bounds = array<i64: 1, 4, 256>}, {transform_indices = @transform_2, window_bounds = array<i64: 1, 8, 128>}]} {
    %c0_i32 = arith.constant 0 : i32
    %0 = arith.cmpi eq, %arg1, %c0_i32 : i32
    %1 = arith.extui %0 : i1 to i32
    %c0_i32_0 = arith.constant 0 : i32
    %2 = arith.cmpi ne, %1, %c0_i32_0 : i32
    scf.if %2 {
      %cst_21 = arith.constant 0.000000e+00 : f32
      %33 = vector.broadcast %cst_21 : f32 to vector<1x1xf32>
      %c0_22 = arith.constant 0 : index
      %c0_23 = arith.constant 0 : index
      %34 = vector.load %arg5[%c0_22, %c0_23] : memref<1x1xf32, #tpu.memory_space<vmem>>, vector<1x1xf32>
      tpu.vector_store %arg5[%c0_22, %c0_23], %33 {strides = array<i32>} : memref<1x1xf32, #tpu.memory_space<vmem>>, vector<1x1xf32>,
      %cst_24 = arith.constant 0.000000e+00 : f32
      %35 = vector.broadcast %cst_24 : f32 to vector<1x1xf32>
      %c0_25 = arith.constant 0 : index
      %c0_26 = arith.constant 0 : index
      %36 = vector.load %arg6[%c0_25, %c0_26] : memref<1x1xf32, #tpu.memory_space<vmem>>, vector<1x1xf32>
      tpu.vector_store %arg6[%c0_25, %c0_26], %35 {strides = array<i32>} : memref<1x1xf32, #tpu.memory_space<vmem>>, vector<1x1xf32>,
    } else {
    }
    %c0 = arith.constant 0 : index
    %c0_1 = arith.constant 0 : index
    %c0_2 = arith.constant 0 : index
    %3 = vector.load %arg2[%c0, %c0_1, %c0_2] : memref<1x4x256xf32, #tpu.memory_space<vmem>>, vector<1x4x256xf32>
    %4 = vector.shape_cast %3 : vector<1x4x256xf32> to vector<4x256xf32>
    %c0_3 = arith.constant 0 : index
    %c0_4 = arith.constant 0 : index
    %c0_5 = arith.constant 0 : index
    %5 = vector.load %arg3[%c0_3, %c0_4, %c0_5] : memref<1x4x256xf32, #tpu.memory_space<vmem>>, vector<1x4x256xf32>
    %6 = vector.shape_cast %5 : vector<1x4x256xf32> to vector<4x256xf32>
    %cst = arith.constant dense<0xFF800000> : vector<256xf32>
    %7 = vector.multi_reduction <maximumf>, %4, %cst [0] : vector<4x256xf32> to vector<256xf32>
    %8 = vector.shape_cast %7 : vector<256xf32> to vector<1x256xf32>
    %9 = vector.broadcast %8 : vector<1x256xf32> to vector<4x256xf32>
    %10 = arith.subf %4, %9 : vector<4x256xf32>
    %11 = math.exp %10 : vector<4x256xf32>
    %cst_6 = arith.constant dense<0.000000e+00> : vector<256xf32>
    %12 = vector.multi_reduction <add>, %11, %cst_6 [0] : vector<4x256xf32> to vector<256xf32>
    %13 = vector.shape_cast %12 : vector<256xf32> to vector<1x256xf32>
    %14 = arith.mulf %11, %6 : vector<4x256xf32>
    %cst_7 = arith.constant dense<0.000000e+00> : vector<256xf32>
    %15 = vector.multi_reduction <add>, %14, %cst_7 [0] : vector<4x256xf32> to vector<256xf32>
    %16 = vector.shape_cast %15 : vector<256xf32> to vector<1x256xf32>
    %17 = arith.divf %16, %13 : vector<1x256xf32>
    %cst_8 = arith.constant dense<0.000000e+00> : vector<256xf32>
    %18 = vector.multi_reduction <add>, %6, %cst_8 [0] : vector<4x256xf32> to vector<256xf32>
    %19 = vector.shape_cast %18 : vector<256xf32> to vector<1x256xf32>
    %c0_9 = arith.constant 0 : index
    %c0_10 = arith.constant 0 : index
    %20 = vector.load %arg5[%c0_9, %c0_10] : memref<1x1xf32, #tpu.memory_space<vmem>>, vector<1x1xf32>
    %cst_11 = arith.constant dense<0.000000e+00> : vector<1xf32>
    %21 = vector.multi_reduction <add>, %17, %cst_11 [1] : vector<1x256xf32> to vector<1xf32>
    %22 = vector.shape_cast %21 : vector<1xf32> to vector<1x1xf32>
    %23 = arith.addf %20, %22 : vector<1x1xf32>
    %c0_12 = arith.constant 0 : index
    %c0_13 = arith.constant 0 : index
    %24 = vector.load %arg5[%c0_12, %c0_13] : memref<1x1xf32, #tpu.memory_space<vmem>>, vector<1x1xf32>
    tpu.vector_store %arg5[%c0_12, %c0_13], %23 {strides = array<i32>} : memref<1x1xf32, #tpu.memory_space<vmem>>, vector<1x1xf32>,
    %c0_14 = arith.constant 0 : index
    %c0_15 = arith.constant 0 : index
    %25 = vector.load %arg6[%c0_14, %c0_15] : memref<1x1xf32, #tpu.memory_space<vmem>>, vector<1x1xf32>
    %cst_16 = arith.constant dense<0.000000e+00> : vector<1xf32>
    %26 = vector.multi_reduction <add>, %19, %cst_16 [1] : vector<1x256xf32> to vector<1xf32>
    %27 = vector.shape_cast %26 : vector<1xf32> to vector<1x1xf32>
    %28 = arith.addf %25, %27 : vector<1x1xf32>
    %c0_17 = arith.constant 0 : index
    %c0_18 = arith.constant 0 : index
    %29 = vector.load %arg6[%c0_17, %c0_18] : memref<1x1xf32, #tpu.memory_space<vmem>>, vector<1x1xf32>
    tpu.vector_store %arg6[%c0_17, %c0_18], %28 {strides = array<i32>} : memref<1x1xf32, #tpu.memory_space<vmem>>, vector<1x1xf32>,
    %c0_i32_19 = arith.constant 0 : i32
    %30 = arith.cmpi eq, %arg1, %c0_i32_19 : i32
    %31 = arith.extui %30 : i1 to i32
    %c0_i32_20 = arith.constant 0 : i32
    %32 = arith.cmpi ne, %31, %c0_i32_20 : i32
    scf.if %32 {
      %c0_21 = arith.constant 0 : index
      %c0_22 = arith.constant 0 : index
      %33 = vector.load %arg5[%c0_21, %c0_22] : memref<1x1xf32, #tpu.memory_space<vmem>>, vector<1x1xf32>
      %c0_23 = arith.constant 0 : index
      %c0_24 = arith.constant 0 : index
      %34 = vector.load %arg6[%c0_23, %c0_24] : memref<1x1xf32, #tpu.memory_space<vmem>>, vector<1x1xf32>
      %35 = arith.subf %34, %33 : vector<1x1xf32>
      %cst_25 = arith.constant 2.560000e+02 : f32
      %36 = vector.broadcast %cst_25 : f32 to vector<1x1xf32>
      %37 = arith.subf %36, %33 : vector<1x1xf32>
      %cst_26 = arith.constant 0.699999988 : f32
      %38 = vector.broadcast %cst_26 : f32 to vector<1x1xf32>
      %39 = arith.mulf %38, %35 : vector<1x1xf32>
      %40 = arith.addf %33, %39 : vector<1x1xf32>
      %cst_27 = arith.constant 3.000000e-01 : f32
      %41 = vector.broadcast %cst_27 : f32 to vector<1x1xf32>
      %42 = arith.mulf %41, %37 : vector<1x1xf32>
      %43 = arith.addf %40, %42 : vector<1x1xf32>
      %44 = arith.divf %33, %43 : vector<1x1xf32>
      %cst_28 = arith.constant 1.000000e+00 : f32
      %45 = vector.broadcast %cst_28 : f32 to vector<1x1xf32>
      %46 = arith.subf %45, %44 : vector<1x1xf32>
      %cst_29 = arith.constant 0.000000e+00 : f32
      %47 = vector.broadcast %cst_29 : f32 to vector<1x1xf32>
      %48 = arith.maximumf %46, %47 : vector<1x1xf32>
      %cst_30 = arith.constant 7.500000e-01 : f32
      %49 = vector.broadcast %cst_30 : f32 to vector<1x1xf32>
      %50 = math.powf %48, %49 : vector<1x1xf32>
      %51 = vector.shape_cast %50 : vector<1x1xf32> to vector<1x1x1xf32>
      %52 = vector.broadcast %51 : vector<1x1x1xf32> to vector<1x8x128xf32>
      %c0_31 = arith.constant 0 : index
      %c0_32 = arith.constant 0 : index
      %c0_33 = arith.constant 0 : index
      %53 = vector.load %arg4[%c0_31, %c0_32, %c0_33] : memref<1x8x128xf32, #tpu.memory_space<vmem>>, vector<1x8x128xf32>
      tpu.vector_store %arg4[%c0_31, %c0_32, %c0_33], %52 {strides = array<i32>} : memref<1x8x128xf32, #tpu.memory_space<vmem>>, vector<1x8x128xf32>,
    } else {
    }
    return
  }
  func.func @transform_0(%arg0: i32, %arg1: i32) -> (i32, i32, i32) {
    %c0_i32 = arith.constant 0 : i32
    %c0_i32_0 = arith.constant 0 : i32
    return %arg0, %c0_i32, %arg1 : i32, i32, i32
  }
  func.func @transform_1(%arg0: i32, %arg1: i32) -> (i32, i32, i32) {
    %c0_i32 = arith.constant 0 : i32
    %c0_i32_0 = arith.constant 0 : i32
    return %arg0, %c0_i32, %arg1 : i32, i32, i32
  }
  func.func @transform_2(%arg0: i32, %arg1: i32) -> (i32, i32, i32) {
    %c0_i32 = arith.constant 0 : i32
    %c0_i32_0 = arith.constant 0 : i32
    %c0_i32_1 = arith.constant 0 : i32
    return %arg0, %c0_i32, %c0_i32_0 : i32, i32, i32
  }
}

</mosaic_0001>

<bundles_post_ra>
// kernel: tpu_custom_call.1
= control target key start
LH: loop header
LB: loop body
LE: loop exit
PB: predicated region body
PF: predicated region fallthrough
CT: control target
= control target key end

     0   :  { %7 = vsyncpa [#allocation5], 0  ;;  %s996_s0 = inlined_call_operand.hbm [shape: f32[2,4,256], index: 0, kind: input, shape index: {}]   ;;  %s997_s1 = inlined_call_operand.hbm [shape: f32[2,4,256], index: 1, kind: input, shape index: {}]   ;;  %s998_s2 = inlined_call_operand.hbm [shape: f32[2,8,128], index: 2, kind: output, shape index: {}]  }
   0x1   :  { %9 = vsyncpa [#allocation5 + $0x1], 0 }
   0x2   :  { %10 = vsyncpa [#allocation8], 0 }
   0x3   :  { %12 = vsyncpa [#allocation8 + $0x1], 0 }
   0x4   :  { %13 = vsyncpa [#allocation6], 0 }
   0x5   :  { %15 = vsyncpa [#allocation6 + $0x1], 0  ;;  %s759_s9 = smov 0   ;;  %s761_s10 = smov 0  }
   0x6   :  { %s763_s11 = smov 0   ;;  %s765_s12 = smov 0  }
   0x7   :  { %s767_s13 = smov 0   ;;  %s769_s14 = smov 0  }
   0x8 LB: > { %s470_s15 = sadd.s32 4294967295, %s737_s14   ;;  %s471_s16 = sadd.s32 4294967294, %s737_s14   ;;  %s737_s14 = sphi %s769_s14, %s21_s14   ;;  %s733_s13 = sphi %s767_s13, %s1018_s13   ;;  %s729_s12 = sphi %s765_s12, %s1017_s12   ;;  %s725_s11 = sphi %s763_s11, %s1016_s11   ;;  %s721_s10 = sphi %s761_s10, %s1015_s10   ;;  %s717_s9 = sphi %s759_s9, %s1014_s9  }
   0x9   : > { %s33_s17 = sadd.s32 1, %s733_s13  ;;  %s42_s18 = sadd.s32 1, %s725_s11 }
   0xa   : > { %p35_p0 = scmp.ge.s32.totalorder %s33_s17, 2  ;;  %p49_p1 = scmp.ne.s32.totalorder %s725_s11, %s721_s10 }
   0xb   : > { %p50_p2 = scmp.eq.s32.totalorder %s737_s14, 0  ;;  %p55_p3 = scmp.ne.s32.totalorder %s721_s10, %s717_s9 }
   0xc   : > { %s1020_s17 = smov (%p35_p0, %s33_s17), 0  ;;  %p56_p5 = scmp.eq.s32.totalorder %s470_s15, 0 }
   0xd   : > { %p800_p4 = por %p50_p2, %p49_p1  ;;  %s37_s20 = ssub.s32 %s733_s13, %s1020_s17 }
   0xe   : > { %p107_p6 = scmp.eq.s32.totalorder %s470_s15, 1  ;;  %p40_p7 = scmp.eq.s32.totalorder %s37_s20, 0 }
   0xf   : > { %p806_p8 = por %p56_p5, %p55_p3  ;;  %p113_p10 = scmp.eq.s32.totalorder %s471_s16, 1 }
  0x10   : > { %p810_p9 = por %p107_p6, %p49_p1  ;;  %p523_p13 = scmp.lt.s32.totalorder %s737_s14, 2 }
  0x11   : > { %s1002_s21 = scalar_select %p806_p8, 1, 0 }
  0x12   : > { %s1003_s22 = scalar_select %p810_p9, 1, 0 }
  0x13   : > { %s815_s23 = scalar_select %p40_p7, %s725_s11, %s42_s18  }
  0x14   : > { %p817_p11 = por %p113_p10, %p55_p3  ;;  %s824_s25 = sand.u32 1, %s725_s11  }
  0x15   : > { %s474_s26 = sshll.u32 %s824_s25, 3  ;;  %s488_s27 = sshll.u32 %s733_s13, 7 }
  0x16   : > { %s1004_s24 = scalar_select %p817_p11, 1, 0 }
  0x17   : > { %s833_s30 = scalar_lea.hbm %s996_s0, %s488_s27  ;;  %s137_s3 = scalar_lea.vmem [#allocation4], %s474_s26 }
  0x18   : > { %s147_s4 = sshll.u32 %s137_s3, 4  ;;  %p841_p0 = pnand %p523_p13, %p800_p4  ;;  %s837_s4 = int_to_ptr.vmem [resolvable:$true] %s147_s4 }
  0x19   : > { %s134_s6 = scalar_lea.sflag [#allocation5], %s824_s25  ;;  %s591_s7 = scalar_lea.hbm %s833_s30, 128 }
  0x1a   : > { %p592_p3 = scmp.ne.s32.totalorder %s833_s30, %s591_s7  ;;  %p593_p5 = pneg %p841_p0 }
  0x1b   : > { %s596_s16 = scalar_lea.hbm %s996_s0, 256  ;;  %p597_p4 = scmp.lt.u32.totalorder %s833_s30, %s996_s0 }
  0x1c   : > { %p594_p6 = pnand %p593_p5, %p592_p3  ;;  %p598_p10 = scmp.lt.u32.totalorder %s596_s16, %s591_s7 }
  0x1d   : > { %p600_p12 = scmp.lt.u32.totalorder %s591_s7, %s833_s30 }
  0x1e   : > { %p595_p7 = pneg %p594_p6  ;;  %p599_p13 = por %p598_p10, %p597_p4 }
  0x20   : > { %p601_p1 = por %p600_p12, %p599_p13 }
  0x22   : > { %p602_p2 = pnand %p601_p1, %p595_p7 }
  0x24   : > { %605 = shalt.err (!%p602_p2)
}
  0x25   : > { %s606_s20 = scalar_lea.vmem %s837_s4, 128  ;;  %s739_s28 = smov [#allocation4]  }
  0x26   : > { %p607_p3 = scmp.ne.s32.totalorder %s837_s4, %s606_s20  ;;  %s611_s29 = sshll.u32 %s739_s28, 4  ;;  %s612_s29 = int_to_ptr.vmem [resolvable:$false] %s611_s29 }
  0x27   : > { %s613_s3 = scalar_lea.vmem %s612_s29, 256  ;;  %p614_p9 = scmp.lt.s32.totalorder %s837_s4, %s612_s29 }
  0x28   : > { %p609_p6 = pnand %p607_p3, %p593_p5  ;;  %p615_p4 = scmp.lt.s32.totalorder %s613_s3, %s606_s20 }
  0x2a   : > { %p610_p11 = pneg %p609_p6  ;;  %p616_p10 = por %p615_p4, %p614_p9 }
  0x2c   : > { %p617_p12 = pnand %p616_p10, %p610_p11 }
  0x2e   : > { %620 = shalt.err (!%p617_p12)
}
  0x2f   : > { %515 = dma.hbm_to_vmem [thread:$0]  (!%p841_p0), %s833_s30, 128, %s837_s4, %s134_s6  }
  0x30   : > { %p1006_p1 = scmp.lt.s32.totalorder %s737_s14, 3  ;;  %p1007_p2 = scmp.ge.s32.totalorder %s737_s14, 1 }
  0x31   : > { %s886_s16 = scalar_lea.hbm %s997_s1, %s488_s27  ;;  %s158_s18 = scalar_lea.vmem [#allocation7], %s474_s26 }
  0x32   : > { %p877_p7 = pnand %p1007_p2, %p1006_p1  ;;  %s168_s19 = sshll.u32 %s158_s18, 4  ;;  %s169_s19 = int_to_ptr.vmem [resolvable:$true] %s168_s19 }
  0x33   : > { %s155_s30 = scalar_lea.sflag [#allocation8], %s824_s25  ;;  %s621_s4 = scalar_lea.hbm %s886_s16, 128 }
  0x34   : > { %s1008_s7 = scalar_select %p877_p7, 1, 0 }
  0x35   : > { %p622_p9 = scmp.ne.s32.totalorder %s886_s16, %s621_s4  ;;  %s626_s27 = scalar_lea.hbm %s997_s1, 256 }
  0x36   : > { %p627_p3 = scmp.lt.u32.totalorder %s886_s16, %s997_s1  ;;  %p628_p6 = scmp.lt.u32.totalorder %s626_s27, %s621_s4 }
  0x37   : > { %p624_p11 = pnand %p622_p9, %p593_p5  ;;  %p630_p10 = scmp.lt.u32.totalorder %s621_s4, %s886_s16 }
  0x38   : > { %p629_p4 = por %p628_p6, %p627_p3 }
  0x39   : > { %p625_p13 = pneg %p624_p11 }
  0x3a   : > { %p631_p12 = por %p630_p10, %p629_p4 }
  0x3c   : > { %p632_p1 = pnand %p631_p12, %p625_p13 }
  0x3e   : > { %635 = shalt.err (!%p632_p1)
}
  0x3f   : > { %s636_s25 = scalar_lea.vmem %s169_s19, 128  ;;  %s740_s26 = smov [#allocation7]  }
  0x40   : > { %p637_p2 = scmp.ne.s32.totalorder %s169_s19, %s636_s25  ;;  %s641_s3 = sshll.u32 %s740_s26, 4  ;;  %s642_s3 = int_to_ptr.vmem [resolvable:$false] %s641_s3 }
  0x41   : > { %s643_s8 = scalar_lea.vmem %s642_s3, 256  ;;  %p644_p8 = scmp.lt.s32.totalorder %s169_s19, %s642_s3 }
  0x42   : > { %p639_p9 = pnand %p637_p2, %p593_p5  ;;  %p645_p7 = scmp.lt.s32.totalorder %s643_s8, %s636_s25 }
  0x44   : > { %p640_p11 = pneg %p639_p9  ;;  %p646_p3 = por %p645_p7, %p644_p8 }
  0x46   : > { %p647_p6 = pnand %p646_p3, %p640_p11 }
  0x48   : > { %650 = shalt.err (!%p647_p6)
}
  0x49   : > { %518 = dma.hbm_to_vmem [thread:$0]  (!%p841_p0), %s886_s16, 128, %s169_s19, %s155_s30  }
  0x4a   : > { %p1009_p13 = scmp.ne.s32.totalorder %s1008_s7, 0 }
  0x4b   : > { %s913_s15 = sand.u32 (!%p1009_p13), 1, %s721_s10   ;;  %p1010_p8 = scmp.ne.s32.totalorder (!%p1009_p13), %s1002_s21, 0 }
  0x4c   : > { %177 = sbr.rel (%p1009_p13) target bundleno = 505 (0x1f9), region = 28  ;;  %s916_s18 = sshll.u32 (!%p1009_p13), %s913_s15, 3 }
  0x4d   : > { %s180_s4 = scalar_lea.sflag (!%p1009_p13), [#allocation5], %s913_s15  ;;  %s183_s6 = scalar_lea.vmem (!%p1009_p13), [#allocation4], %s916_s18 }
  0x53   : > { %704 = dma.done.wait (%p1010_p8), %s180_s4, 128  }
  0x54   : > { %706 = vsyncadd (%p1010_p8), %s180_s4, 4294967168  ;;  %s189_s5 = scalar_lea.sflag [#allocation8], %s913_s15  ;;  %s192_s7 = scalar_lea.vmem [#allocation7], %s916_s18 }
  0x55   : > { %708 = dma.done.wait (%p1010_p8), %s189_s5, 128  }
  0x56   : > { %710 = vsyncadd (%p1010_p8), %s189_s5, 4294967168  ;;  %vm224_vm0 = vcmask 0   ;;  %v741_v0 = vmov 0.0   ;;  %vm232_vm1 = vcmask 1043456   ;;  %v227_v1 = vld [vmem:[%s183_s6] sm:$0xff]  ;;  %v228_v20 = vld [vmem:[%s192_s7] sm:$0xff] }
  0x57   : > { %225 = vst.msk [vmem:[#allocation2] sm:$0x1] %vm224_vm0, %v741_v0  ;;  %226 = vst.msk [vmem:[#allocation3] sm:$0x1] %vm224_vm0, %v741_v0  ;;  %v230_v2 = vcombine.high %v227_v1, %v227_v1  ;;  %v233_v3 = vsel %vm232_vm1, %v227_v1, -inf  ;;  %v294_v22 = vcombine.high %v228_v20, %v228_v20  ;;  %v296_v30 = vsel %vm232_vm1, %v228_v20, 0.0 }
  0x58   : > { %v234_v4 = vrot.slane %v233_v3, 4  ;;  %v297_v40 = vrot.slane %v296_v30, 4  ;;  %s217_s21 = scalar_lea.vmem [#allocation9], %s916_s18  ;;  %s485_s19 = sshll.u32 %s729_s12, 7 }
  0x59   : > { %v240_v5 = vsel %vm232_vm1, %v230_v2, -inf  ;;  %v303_v34 = vsel %vm232_vm1, %v294_v22, 0.0  ;;  %s363_s16 = sshll.u32 %s217_s21, 4  ;;  %s949_s27 = scalar_lea.hbm %s998_s2, %s485_s19  ;;  %s944_s16 = int_to_ptr.vmem [resolvable:$true] %s363_s16 }
  0x5a   : > { %v235_v6 = vmax.f32 %v233_v3, %v234_v4  ;;  %v241_v7 = vrot.slane %v240_v5, 4  ;;  %v304_v41 = vrot.slane %v303_v34, 4  ;;  %v298_v49 = vadd.f32 %v297_v40, %v296_v30  ;;  %s350_s28 = scalar_lea.sflag [#allocation6], %s913_s15  ;;  %s651_s29 = scalar_lea.vmem %s944_s16, 128 }
  0x5b   : > { %p652_p0 = scmp.ne.s32.totalorder %s944_s16, %s651_s29  ;;  %p1011_p5 = scmp.ne.s32.totalorder %s1003_s22, 0 }
  0x5c   : > { %v236_v8 = vrot.slane %v235_v6, 2  ;;  %v242_v9 = vmax.f32 %v240_v5, %v241_v7  ;;  %v305_v50 = vadd.f32 %v304_v41, %v303_v34  ;;  %v299_v56 = vrot.slane %v298_v49, 2  ;;  %s743_s25 = smov [#allocation9]  }
  0x5d   : > { %v340_v34 = vlaneseq  ;;  %p653_p7 = pnand %p652_p0, %p1011_p5  ;;  %s655_s12 = sshll.u32 %s743_s25, 4  ;;  %s656_s12 = int_to_ptr.vmem [resolvable:$false] %s655_s12 }
  0x5e   : > { %v237_v10 = vmax.f32 %v235_v6, %v236_v8  ;;  %v243_v11 = vrot.slane %v242_v9, 2  ;;  %v306_v57 = vrot.slane %v305_v50, 2  ;;  %v300_v60 = vadd.f32 %v299_v56, %v298_v49  ;;  %s657_s26 = scalar_lea.vmem %s656_s12, 256  ;;  %p658_p10 = scmp.lt.s32.totalorder %s944_s16, %s656_s12 }
  0x5f   : > { %p654_p4 = pneg %p653_p7  ;;  %p659_p12 = scmp.lt.s32.totalorder %s657_s26, %s651_s29 }
  0x60   : > { %v238_v12 = vrot.slane %v237_v10, 1  ;;  %v244_v13 = vmax.f32 %v242_v9, %v243_v11  ;;  %v307_v61 = vadd.f32 %v306_v57, %v305_v50  ;;  %v301_v0 = vrot.slane %v300_v60, 1  ;;  %v310_v11 = vld [vmem:[#allocation2] sm:$0x1] }
  0x61   : > { %p660_p1 = por %p659_p12, %p658_p10 }
  0x62   : > { %v239_v14 = vmax.f32 %v237_v10, %v238_v12  ;;  %v245_v15 = vrot.slane %v244_v13, 1  ;;  %v302_v6 = vadd.f32 %v301_v0, %v300_v60  ;;  %v742_v10 = vmov 0  }
  0x63   : > { %575 = vset.pattern.permute.xlu1 %v742_v10  ;;  %576 = vset.pattern.permute.xlu0 %v742_v10  ;;  %p661_p2 = pnand %p660_p1, %p654_p4 }
  0x64   : > { %v246_v16 = vmax.f32 %v244_v13, %v245_v15 }
  0x66   : > { %v249_v17 = vcombine.low %v239_v14, %v246_v16  ;;  %v317_v14 = vld [vmem:[#allocation3] sm:$0x1] }
  0x68   : > { %v251_v18 = vsub.f32 %v227_v1, %v249_v17  ;;  %v308_v1 = vrot.slane %v307_v61, 1 }
  0x6a   : > { %v252_v19 = vmul.f32 1.442695, %v251_v18  ;;  %v309_v7 = vadd.f32 %v308_v1, %v307_v61 }
  0x6c   : > { %579 = vpow2.f32 %v252_v19  ;;  %v318_v9 = vadd.f32 %v309_v7, %v302_v6 }
  0x76   : > { %v580_v21 = vpop.eup %579 }
  0x77   : > { %v255_v23 = vcombine.high %v580_v21, %v580_v21  ;;  %v257_v24 = vsel %vm232_vm1, %v580_v21, 0.0  ;;  %v271_v25 = vmul.f32 %v580_v21, %v228_v20 }
  0x78   : > { %v258_v26 = vrot.slane %v257_v24, 4 }
  0x79   : > { %v264_v27 = vsel %vm232_vm1, %v255_v23, 0.0  ;;  %v273_v28 = vcombine.high %v271_v25, %v271_v25  ;;  %v275_v29 = vsel %vm232_vm1, %v271_v25, 0.0 }
  0x7a   : > { %v259_v31 = vadd.f32 %v258_v26, %v257_v24  ;;  %v265_v32 = vrot.slane %v264_v27, 4  ;;  %v276_v33 = vrot.slane %v275_v29, 4 }
  0x7b   : > { %v282_v35 = vsel %vm232_vm1, %v273_v28, 0.0 }
  0x7c   : > { %v260_v36 = vrot.slane %v259_v31, 2  ;;  %v266_v37 = vadd.f32 %v265_v32, %v264_v27  ;;  %v277_v38 = vadd.f32 %v276_v33, %v275_v29  ;;  %v283_v39 = vrot.slane %v282_v35, 4 }
  0x7e   : > { %v261_v42 = vadd.f32 %v260_v36, %v259_v31  ;;  %v267_v43 = vrot.slane %v266_v37, 2  ;;  %v284_v44 = vadd.f32 %v283_v39, %v282_v35  ;;  %v278_v45 = vrot.slane %v277_v38, 2 }
  0x7f   : > { %v341_v35 = vshrl.u32 %v340_v34, 7 }
  0x80   : > { %v262_v46 = vrot.slane %v261_v42, 1  ;;  %v268_v47 = vadd.f32 %v267_v43, %v266_v37  ;;  %v285_v48 = vrot.slane %v284_v44, 2  ;;  %v279_v53 = vadd.f32 %v278_v45, %v277_v38 }
  0x81   : > { %v342_v39 = vsub.s32 0, %v341_v35 }
  0x82   : > { %v263_v51 = vadd.f32 %v262_v46, %v261_v42  ;;  %v269_v52 = vrot.slane %v268_v47, 1  ;;  %v286_v55 = vadd.f32 %v285_v48, %v284_v44  ;;  %v280_v58 = vrot.slane %v279_v53, 1 }
  0x84   : > { %v270_v54 = vadd.f32 %v269_v52, %v268_v47  ;;  %581 = vrcp.f32 %v263_v51  ;;  %v287_v59 = vrot.slane %v286_v55, 1  ;;  %v281_v62 = vadd.f32 %v280_v58, %v279_v53 }
  0x86   : > { %583 = vrcp.f32 %v270_v54  ;;  %v288_v63 = vadd.f32 %v287_v59, %v286_v55 }
  0x8e   : > { %v582_v2 = vpop.eup %581 }
  0x8f   : > { %v290_v3 = vmul.f32 %v582_v2, %v281_v62 }
  0x90   : > { %v584_v4 = vpop.eup %583 }
  0x91   : > { %v292_v5 = vmul.f32 %v584_v4, %v288_v63 }
  0x93   : > { %v311_v8 = vadd.f32 %v292_v5, %v290_v3 }
  0x95   : > { %312 = vadd.xlane.f32.xlu0 %v311_v8 }
  0x99   : > { %319 = vadd.xlane.f32.xlu0 %v318_v9 }
 0x122   : > { %v313_v12 = vpop.xlane.xlu0 %312 }
 0x123   : > { %v314_v13 = vadd.f32 %v313_v12, %v310_v11 }
 0x125   : > { %316 = vst.msk [vmem:[#allocation2] sm:$0x1] %vm224_vm0, %v314_v13 }
 0x126   : > { %v320_v15 = vpop.xlane.xlu0 %319 }
 0x127   : > { %v321_v16 = vadd.f32 %v320_v15, %v317_v14 }
 0x129   : > { %322 = vst.msk [vmem:[#allocation3] sm:$0x1] %vm224_vm0, %v321_v16 }
 0x12c   : > { %v326_v17 = vld [vmem:[#allocation2] sm:$0x1] }
 0x12d   : > { %v329_v19 = vsub.f32 256.0, %v326_v17 }
 0x12f   : > { %v332_v22 = vmul.f32 0.3, %v329_v19 }
 0x130   : > { %v327_v18 = vld [vmem:[#allocation3] sm:$0x1] }
 0x131   : > { %v328_v20 = vsub.f32 %v327_v18, %v326_v17 }
 0x133   : > { %v330_v21 = vmul.f32 0.7, %v328_v20 }
 0x135   : > { %v331_v23 = vadd.f32 %v330_v21, %v326_v17 }
 0x137   : > { %v333_v24 = vadd.f32 %v332_v22, %v331_v23 }
 0x139   : > { %585 = vrcp.f32 %v333_v24 }
 0x143   : > { %v586_v25 = vpop.eup %585 }
 0x144   : > { %v335_v26 = vmul.f32 %v586_v25, %v326_v17 }
 0x146   : > { %v336_v27 = vsub.f32 1.0, %v335_v26 }
 0x148   : > { %v337_v28 = vmax.f32 %v336_v27, 0.0 }
 0x14a   : > { %587 = vrsqrt.f32 %v337_v28  ;;  %vm496_vm2 = vcmp.eq.f32.partialorder %v337_v28, inf  ;;  %v499_v31 = vand.u32 2147483648, %v337_v28  ;;  %vm490_vm3 = vcmp.eq.f32.partialorder %v337_v28, 0.0 }
 0x14b   : > { %v492_v37 = vand.u32 2147483647, %v337_v28  ;;  %vm491_vm4 = vcmp.lt.f32.partialorder %v337_v28, 0.0 }
 0x14d   : > { %vm493_vm5 = vcmp.eq.f32.partialorder %v492_v37, inf }
 0x154   : > { %v588_v29 = vpop.eup %587 }
 0x155   : > { %v495_v30 = vmul.f32 %v588_v29, %v337_v28 }
 0x157   : > { %v497_v32 = vsel %vm496_vm2, %v337_v28, %v495_v30 }
 0x158   : > { %v500_v33 = vsel %vm490_vm3, %v499_v31, %v497_v32 }
 0x159   : > { %589 = vrsqrt.f32 %v500_v33 }
 0x163   : > { %v590_v36 = vpop.eup %589 }
 0x164   : > { %v502_v38 = vmul.f32 %v590_v36, %v337_v28 }
 0x166   : > { %v503_v40 = vsel %vm491_vm4, nan, %v502_v38 }
 0x167   : > { %v504_v41 = vsel %vm490_vm3, 0.0, %v503_v40 }
 0x168   : > { %v505_v42 = vsel %vm493_vm5, inf, %v504_v41 }
 0x169   : > { %v343_v43 = vrot.slane %v505_v42, %v342_v39 }
 0x16b   : > { %345 = vperm.xlu1 %575, %v343_v43  }
 0x1ea   : > { %v346_v44 = vpop.permute.xlu1 %345 }
 0x1eb   : > { %348 = vst [vmem:[%s217_s21] sm:$0xff] %v346_v44 }
 0x1ec   : > { %664 = shalt.err (!%p661_p2)
}
 0x1ed   : > { %s665_s3 = scalar_lea.hbm %s949_s27, 128  ;;  %s669_s18 = scalar_lea.hbm %s998_s2, 256 }
 0x1ee   : > { %p666_p9 = scmp.ne.s32.totalorder %s949_s27, %s665_s3  ;;  %p670_p6 = scmp.lt.u32.totalorder %s949_s27, %s998_s2 }
 0x1ef   : > { %p671_p13 = scmp.lt.u32.totalorder %s669_s18, %s665_s3  ;;  %p673_p0 = scmp.lt.u32.totalorder %s665_s3, %s949_s27 }
 0x1f0   : > { %p667_p11 = pnand %p666_p9, %p1011_p5 }
 0x1f1   : > { %p672_p8 = por %p671_p13, %p670_p6 }
 0x1f2   : > { %p668_p3 = pneg %p667_p11 }
 0x1f3   : > { %p674_p7 = por %p673_p0, %p672_p8 }
 0x1f5   : > { %p675_p4 = pnand %p674_p7, %p668_p3 }
 0x1f7   : > { %678 = shalt.err (!%p675_p4)
}
 0x1f8   : > { %510 = dma.vmem_to_hbm [thread:$0]  (%p1011_p5), %s944_s16, 128, %s949_s27, %s350_s28  }
 0x1f9 PF: > { %s375_s5 = sand.u32 1, %s717_s9   ;;  %p1012_p10 = scmp.ne.s32.totalorder %s1004_s24, 0 }
 0x1fa   : > { %p1013_p12 = scmp.ge.s32.totalorder %s737_s14, 2  ;;  %s376_s7 = scalar_lea.sflag [#allocation6], %s375_s5 }
 0x1fc   : > { %p520_p1 = pnand %p1013_p12, %p1012_p10 }
 0x1fe   : > { %712 = dma.done.wait (!%p520_p1), %s376_s7, 128  }
 0x1ff   : > { %714 = vsyncadd (!%p520_p1), %s376_s7, 4294967168  ;;  %s21_s14 = sadd.s32 1, %s737_s14   ;;  %s1014_s9 = smov %s721_s10 }
 0x200   : > { %p18_p2 = scmp.ge.s32.totalorder %s21_s14, 4   ;;  %s1015_s10 = smov %s725_s11 }
 0x201   : > { %s1016_s11 = smov %s815_s23  ;;  %s1017_s12 = smov %s733_s13 }
 0x202   : > { %s1018_s13 = smov %s1020_s17  ;;  %20 = sbr.rel (!%p18_p2) target bundleno = 8 (0x8), region = 94 }
 0x209   :  { %381 = vsyncpa [#allocation5], 1 }
 0x20a   :  { %383 = vsyncpa [#allocation5 + $0x1], 1 }
 0x20b   :  { %384 = vsyncpa [#allocation8], 1 }
 0x20c   :  { %386 = vsyncpa [#allocation8 + $0x1], 1 }
 0x20d   :  { %387 = vsyncpa [#allocation6], 1 }
 0x20e   :  { %389 = vsyncpa [#allocation6 + $0x1], 1 }

</bundles_post_ra>
